<compile_context>
chip_gen: v7x
topology: tpu7x:2x2x1
jax: 0.10.0
libtpu: 0.0.40
codegen_flags: <defaults>
</compile_context>

<pallas_src>
import functools

import jax
import jax.numpy as jnp
import numpy as np
from jax.experimental import pallas as pl
from jax.experimental.pallas import tpu as pltpu


def _ce_dice_kernel(tmin_ref, logits_ref, tgt_ref, out_ref,
                    ce_acc, cnt_acc, dice_acc,
                    *, ignore_index, hw, tile_n, split, jp, j_total):
    p = pl.program_id(0)
    j = pl.program_id(1)

    @pl.when(j == 0)
    def _init():
        ce_acc[...] = jnp.zeros_like(ce_acc)
        cnt_acc[...] = jnp.zeros_like(cnt_acc)
        dice_acc[...] = jnp.zeros_like(dice_acc)

    x = logits_ref[0].astype(jnp.float32)      # (C, TN): classes on sublanes, pixels on lanes
    t = tgt_ref[0].astype(jnp.int32)           # (1, TN)

    # Absolute pixel-tile index (the leading axis may carry an extra pixel split for N==1).
    if split == 1:
        j_abs = j
    else:
        j_abs = (p % split) * jp + j

    # Ragged-tail / duplicated-clamped-tile mask along the pixel (lane) axis.
    col = jax.lax.broadcasted_iota(jnp.int32, t.shape, dimension=1) + j_abs * tile_n
    in_range = col < hw                        # (1, TN)
    if split > 1:
        in_range = in_range & (j_abs < j_total)

    # Numerically stable log-sum-exp over the class (sublane) axis.
    m = jnp.max(x, axis=0, keepdims=True)      # (1, TN)
    e = jnp.exp(x - m)                         # (C, TN)
    se = jnp.sum(e, axis=0, keepdims=True)     # (1, TN)
    lse = jnp.log(se) + m                      # (1, TN)

    # Single one-hot extraction shared by CE and Dice.
    # PyTorch DiceLoss remaps ignore_index pixels to target.min(); on valid pixels
    # t_d == t so the same gathered logit serves the CE term.
    t_d = jnp.where(t == ignore_index, tmin_ref[0], t)
    cls = jax.lax.broadcasted_iota(jnp.int32, x.shape, dimension=0)        # (C, TN)
    tgt_logit = jnp.sum(jnp.where(cls == t_d, x, 0.0), axis=0, keepdims=True)  # (1, TN)

    # --- cross-entropy partials (reduction='mean', ignore_index pixels excluded) ---
    valid = (t != ignore_index) & in_range
    ce_acc[...] += jnp.where(valid, lse - tgt_logit, 0.0)
    cnt_acc[...] += valid.astype(jnp.float32)

    # --- dice intersection: softmax prob of the remapped target class (EUP exp, no divide) ---
    prob_t = jnp.exp(tgt_logit - lse)          # (1, TN)
    dice_acc[...] += jnp.where(in_range, prob_t, 0.0)

    @pl.when(j == pl.num_programs(1) - 1)
    def _finalize():
        ce_sum = jnp.sum(ce_acc[...])
        cnt = jnp.sum(cnt_acc[...])
        inter = jnp.sum(dice_acc[...])
        lane = jax.lax.broadcasted_iota(jnp.int32, (1, 128), dimension=1)
        row = jnp.where(lane == 0, ce_sum,
              jnp.where(lane == 1, cnt,
              jnp.where(lane == 2, inter, 0.0)))
        out_ref[0] = row                       # lane-dense (1, 128) unmasked store


def ce_dice_loss(output, target, *, smooth=1.0, ignore_index=255, tile_n_max=None):
    """output: (N, C, H, W) float logits; target: (N, H, W) integer class ids."""
    N, C, H, W = output.shape
    HW = H * W

    logits = output.reshape(N, C, HW)                 # pure view of NCHW, no relayout
    tgt = target.reshape(N, 1, HW)                    # native dtype; cast happens in-kernel
    tmin = jnp.min(target).astype(jnp.int32).reshape(1)   # tiny pass over targets only
    # TODO(synk): compute tmin inside the kernel to save this extra target read.

    # --- generation-aware tile sizing -------------------------------------------------
    try:
        vmem_phys = int(pltpu.get_tpu_info().vmem_capacity_bytes)
    except Exception:
        vmem_phys = 64 * 1024 * 1024                  # safe lower bound (v7x)
    # Resident f32-equivalent bytes per pixel column:
    #   2x double-buffered logits (C each) + 2x target + 3 lane-wide accumulators.
    per_col = 4 * (2 * C + 2 + 3)
    budget = min(vmem_phys // 2, 48 * 1024 * 1024)    # leave headroom, esp. 64 MiB v7x
    cap = max(128, (budget // per_col) // 128 * 128)
    if tile_n_max is not None:
        cap = max(128, min(cap, tile_n_max))
    tile_n = HW if HW <= cap else cap                 # full-dim tail or 128-multiple tile

    j_total = -(-HW // tile_n)                        # pixel tiles per image
    # Megacore: the leading grid axis is "parallel".  If there is only one image, split the
    # pixel axis 2 ways across the leading axis so both v7x TensorCores stream HBM.
    split = 2 if (N == 1 and j_total >= 2) else 1
    jp = -(-j_total // split)                         # pixel tiles handled per leading step
    P = N * split
    grid = (P, jp)

    if split == 1:
        logits_map = lambda p, j, tmin_ref: (p, 0, j)
        tgt_map = lambda p, j, tmin_ref: (p, 0, j)
    else:
        def logits_map(p, j, tmin_ref):
            return (p // split, 0, jnp.minimum((p % split) * jp + j, j_total - 1))

        def tgt_map(p, j, tmin_ref):
            return (p // split, 0, jnp.minimum((p % split) * jp + j, j_total - 1))

    resident = tile_n * per_col
    vmem_limit = int(min(vmem_phys, resident + 16 * 1024 * 1024))

    kernel = functools.partial(
        _ce_dice_kernel,
        ignore_index=ignore_index, hw=HW, tile_n=tile_n,
        split=split, jp=jp, j_total=j_total)

    partials = pl.pallas_call(
        kernel,
        out_shape=jax.ShapeDtypeStruct((P, 1, 128), jnp.float32),
        grid_spec=pltpu.PrefetchScalarGridSpec(
            num_scalar_prefetch=1,
            grid=grid,
            in_specs=[
                pl.BlockSpec((1, C, tile_n), logits_map),
                pl.BlockSpec((1, 1, tile_n), tgt_map),
            ],
            out_specs=pl.BlockSpec((1, 1, 128), lambda p, j, tmin_ref: (p, 0, 0)),
            scratch_shapes=[
                pltpu.VMEM((1, tile_n), jnp.float32),   # running CE loss partials (per lane)
                pltpu.VMEM((1, tile_n), jnp.float32),   # running valid-pixel count partials
                pltpu.VMEM((1, tile_n), jnp.float32),   # running dice-intersection partials
            ],
        ),
        compiler_params=pltpu.CompilerParams(
            dimension_semantics=("parallel", "arbitrary"),
            vmem_limit_bytes=vmem_limit),
    )(tmin, logits, tgt)

    ce_sum = jnp.sum(partials[:, 0, 0])
    cnt = jnp.sum(partials[:, 0, 1])
    inter = jnp.sum(partials[:, 0, 2])

    ce = ce_sum / cnt
    # Softmax probs and one-hot targets each sum to 1 per pixel, so the PyTorch
    # denominator output.sum() + target.sum() equals 2 * (#pixels).
    dice = 1.0 - (2.0 * inter + smooth) / (2.0 * float(N * HW) + smooth)
    return ce + dice


def _reference_ce_dice(output, target, smooth=1.0, ignore_index=255):
    """Faithful JAX port of the PyTorch CE_DiceLoss forward."""
    N, C, H, W = output.shape
    logits = jnp.transpose(output, (0, 2, 3, 1)).reshape(-1, C).astype(jnp.float32)
    tgt = target.reshape(-1)

    # CrossEntropyLoss(weight=None, reduction='mean', ignore_index)
    logp = jax.nn.log_softmax(logits, axis=-1)
    safe = jnp.where(tgt == ignore_index, 0, tgt)
    nll = -jnp.take_along_axis(logp, safe[:, None], axis=-1)[:, 0]
    valid = (tgt != ignore_index).astype(jnp.float32)
    ce = jnp.sum(nll * valid) / jnp.sum(valid)

    # DiceLoss: remap ignore pixels to target.min(), all pixels contribute
    tmin = jnp.min(tgt)
    tgt_d = jnp.where(tgt == ignore_index, tmin, tgt)
    probs = jax.nn.softmax(logits, axis=-1)
    onehot = jax.nn.one_hot(tgt_d, C, dtype=jnp.float32)
    inter = jnp.sum(probs * onehot)
    dice = 1.0 - (2.0 * inter + smooth) / (jnp.sum(probs) + jnp.sum(onehot) + smooth)
    return ce + dice


if __name__ == "__main__":
    key = jax.random.PRNGKey(0)
    k1, k2, k3 = jax.random.split(key, 3)

    N, C, H, W = 2, 4, 16, 16
    output = jax.random.normal(k1, (N, C, H, W), dtype=jnp.float32)
    target = jax.random.randint(k2, (N, H, W), 0, C, dtype=jnp.int32)
    # sprinkle some ignore_index pixels (guarantee at least one)
    ignore_mask = jax.random.uniform(k3, (N, H, W)) < 0.1
    target = jnp.where(ignore_mask, 255, target)
    target = target.at[0, 0, 0].set(255)

    loss = jax.block_until_ready(ce_dice_loss(output, target))
    ref = jax.block_until_ready(_reference_ce_dice(output, target))

    np.testing.assert_allclose(np.asarray(loss), np.asarray(ref), rtol=1e-5, atol=1e-5)
    print("KERNEL_OK")
</pallas_src>

<mosaic_0001>
module attributes {stable_mosaic.version = 11 : i64} {
  func.func @_ce_dice_kernel(%arg0: i32, %arg1: i32, %arg2: memref<1xi32, #tpu.memory_space<smem>>, %arg3: memref<1x4x256xf32, #tpu.memory_space<vmem>>, %arg4: memref<1x1x256xi32, #tpu.memory_space<vmem>>, %arg5: memref<1x1x128xf32, #tpu.memory_space<vmem>>, %arg6: memref<1x256xf32, #tpu.memory_space<vmem>>, %arg7: memref<1x256xf32, #tpu.memory_space<vmem>>, %arg8: memref<1x256xf32, #tpu.memory_space<vmem>>) attributes {dimension_semantics = [#tpu.dimension_semantics<parallel>, #tpu.dimension_semantics<arbitrary>], iteration_bounds = array<i64: 2, 1>, scalar_prefetch = 1 : i64, scratch_operands = 3 : i64, tpu.core_type = #tpu.core_type<tc>, window_params = [{transform_indices = @transform_0, window_bounds = array<i64: 1, 4, 256>}, {transform_indices = @transform_1, window_bounds = array<i64: 1, 1, 256>}, {transform_indices = @transform_2, window_bounds = array<i64: 1, 1, 128>}]} {
    %c0_i32 = arith.constant 0 : i32
    %0 = arith.cmpi eq, %arg1, %c0_i32 : i32
    %1 = arith.extui %0 : i1 to i32
    %c0_i32_0 = arith.constant 0 : i32
    %2 = arith.cmpi ne, %1, %c0_i32_0 : i32
    scf.if %2 {
      %cst_28 = arith.constant 0.000000e+00 : f32
      %58 = vector.broadcast %cst_28 : f32 to vector<1x256xf32>
      %c0_29 = arith.constant 0 : index
      %c0_30 = arith.constant 0 : index
      %59 = vector.load %arg6[%c0_29, %c0_30] : memref<1x256xf32, #tpu.memory_space<vmem>>, vector<1x256xf32>
      tpu.vector_store %arg6[%c0_29, %c0_30], %58 {strides = array<i32>} : memref<1x256xf32, #tpu.memory_space<vmem>>, vector<1x256xf32>,
      %cst_31 = arith.constant 0.000000e+00 : f32
      %60 = vector.broadcast %cst_31 : f32 to vector<1x256xf32>
      %c0_32 = arith.constant 0 : index
      %c0_33 = arith.constant 0 : index
      %61 = vector.load %arg7[%c0_32, %c0_33] : memref<1x256xf32, #tpu.memory_space<vmem>>, vector<1x256xf32>
      tpu.vector_store %arg7[%c0_32, %c0_33], %60 {strides = array<i32>} : memref<1x256xf32, #tpu.memory_space<vmem>>, vector<1x256xf32>,
      %cst_34 = arith.constant 0.000000e+00 : f32
      %62 = vector.broadcast %cst_34 : f32 to vector<1x256xf32>
      %c0_35 = arith.constant 0 : index
      %c0_36 = arith.constant 0 : index
      %63 = vector.load %arg8[%c0_35, %c0_36] : memref<1x256xf32, #tpu.memory_space<vmem>>, vector<1x256xf32>
      tpu.vector_store %arg8[%c0_35, %c0_36], %62 {strides = array<i32>} : memref<1x256xf32, #tpu.memory_space<vmem>>, vector<1x256xf32>,
    } else {
    }
    %c0 = arith.constant 0 : index
    %c0_1 = arith.constant 0 : index
    %c0_2 = arith.constant 0 : index
    %3 = vector.load %arg3[%c0, %c0_1, %c0_2] : memref<1x4x256xf32, #tpu.memory_space<vmem>>, vector<1x4x256xf32>
    %4 = vector.shape_cast %3 : vector<1x4x256xf32> to vector<4x256xf32>
    %c0_3 = arith.constant 0 : index
    %c0_4 = arith.constant 0 : index
    %c0_5 = arith.constant 0 : index
    %5 = vector.load %arg4[%c0_3, %c0_4, %c0_5] : memref<1x1x256xi32, #tpu.memory_space<vmem>>, vector<1x1x256xi32>
    %6 = vector.shape_cast %5 : vector<1x1x256xi32> to vector<1x256xi32>
    %7 = tpu.iota {dimensions = array<i32: 1>} : vector<1x256xi32>
    %c256_i32 = arith.constant 256 : i32
    %8 = arith.muli %arg1, %c256_i32 : i32
    %9 = vector.broadcast %8 : i32 to vector<1x256xi32>
    %10 = arith.addi %7, %9 : vector<1x256xi32>
    %c256_i32_6 = arith.constant 256 : i32
    %11 = vector.broadcast %c256_i32_6 : i32 to vector<1x256xi32>
    %12 = arith.cmpi slt, %10, %11 : vector<1x256xi32>
    %cst = arith.constant dense<0xFF800000> : vector<256xf32>
    %13 = vector.multi_reduction <maximumf>, %4, %cst [0] : vector<4x256xf32> to vector<256xf32>
    %14 = vector.shape_cast %13 : vector<256xf32> to vector<1x256xf32>
    %15 = vector.broadcast %14 : vector<1x256xf32> to vector<4x256xf32>
    %16 = arith.subf %4, %15 : vector<4x256xf32>
    %17 = math.exp %16 : vector<4x256xf32>
    %cst_7 = arith.constant dense<0.000000e+00> : vector<256xf32>
    %18 = vector.multi_reduction <add>, %17, %cst_7 [0] : vector<4x256xf32> to vector<256xf32>
    %19 = vector.shape_cast %18 : vector<256xf32> to vector<1x256xf32>
    %20 = math.log %19 : vector<1x256xf32>
    %21 = arith.addf %20, %14 : vector<1x256xf32>
    %c255_i32 = arith.constant 255 : i32
    %22 = vector.broadcast %c255_i32 : i32 to vector<1x256xi32>
    %23 = arith.cmpi eq, %6, %22 : vector<1x256xi32>
    %c0_8 = arith.constant 0 : index
    %24 = memref.load %arg2[%c0_8] : memref<1xi32, #tpu.memory_space<smem>>
    %25 = vector.broadcast %24 : i32 to vector<1x256xi32>
    %26 = arith.select %23, %25, %6 : vector<1x256xi1>, vector<1x256xi32>
    %27 = tpu.iota {dimensions = array<i32: 0>} : vector<4x256xi32>
    %28 = vector.broadcast %26 : vector<1x256xi32> to vector<4x256xi32>
    %29 = arith.cmpi eq, %27, %28 : vector<4x256xi32>
    %cst_9 = arith.constant 0.000000e+00 : f32
    %30 = vector.broadcast %cst_9 : f32 to vector<4x256xf32>
    %31 = arith.select %29, %4, %30 : vector<4x256xi1>, vector<4x256xf32>
    %cst_10 = arith.constant dense<0.000000e+00> : vector<256xf32>
    %32 = vector.multi_reduction <add>, %31, %cst_10 [0] : vector<4x256xf32> to vector<256xf32>
    %33 = vector.shape_cast %32 : vector<256xf32> to vector<1x256xf32>
    %c255_i32_11 = arith.constant 255 : i32
    %34 = vector.broadcast %c255_i32_11 : i32 to vector<1x256xi32>
    %35 = arith.cmpi ne, %6, %34 : vector<1x256xi32>
    %36 = arith.andi %35, %12 : vector<1x256xi1>
    %c0_12 = arith.constant 0 : index
    %c0_13 = arith.constant 0 : index
    %37 = vector.load %arg6[%c0_12, %c0_13] : memref<1x256xf32, #tpu.memory_space<vmem>>, vector<1x256xf32>
    %38 = arith.subf %21, %33 : vector<1x256xf32>
    %cst_14 = arith.constant 0.000000e+00 : f32
    %39 = vector.broadcast %cst_14 : f32 to vector<1x256xf32>
    %40 = arith.select %36, %38, %39 : vector<1x256xi1>, vector<1x256xf32>
    %41 = arith.addf %37, %40 : vector<1x256xf32>
    %c0_15 = arith.constant 0 : index
    %c0_16 = arith.constant 0 : index
    %42 = vector.load %arg6[%c0_15, %c0_16] : memref<1x256xf32, #tpu.memory_space<vmem>>, vector<1x256xf32>
    tpu.vector_store %arg6[%c0_15, %c0_16], %41 {strides = array<i32>} : memref<1x256xf32, #tpu.memory_space<vmem>>, vector<1x256xf32>,
    %c0_17 = arith.constant 0 : index
    %c0_18 = arith.constant 0 : index
    %43 = vector.load %arg7[%c0_17, %c0_18] : memref<1x256xf32, #tpu.memory_space<vmem>>, vector<1x256xf32>
    %44 = arith.extui %36 : vector<1x256xi1> to vector<1x256xi32>
    %45 = arith.sitofp %44 : vector<1x256xi32> to vector<1x256xf32>
    %46 = arith.addf %43, %45 : vector<1x256xf32>
    %c0_19 = arith.constant 0 : index
    %c0_20 = arith.constant 0 : index
    %47 = vector.load %arg7[%c0_19, %c0_20] : memref<1x256xf32, #tpu.memory_space<vmem>>, vector<1x256xf32>
    tpu.vector_store %arg7[%c0_19, %c0_20], %46 {strides = array<i32>} : memref<1x256xf32, #tpu.memory_space<vmem>>, vector<1x256xf32>,
    %48 = arith.subf %33, %21 : vector<1x256xf32>
    %49 = math.exp %48 : vector<1x256xf32>
    %c0_21 = arith.constant 0 : index
    %c0_22 = arith.constant 0 : index
    %50 = vector.load %arg8[%c0_21, %c0_22] : memref<1x256xf32, #tpu.memory_space<vmem>>, vector<1x256xf32>
    %cst_23 = arith.constant 0.000000e+00 : f32
    %51 = vector.broadcast %cst_23 : f32 to vector<1x256xf32>
    %52 = arith.select %12, %49, %51 : vector<1x256xi1>, vector<1x256xf32>
    %53 = arith.addf %50, %52 : vector<1x256xf32>
    %c0_24 = arith.constant 0 : index
    %c0_25 = arith.constant 0 : index
    %54 = vector.load %arg8[%c0_24, %c0_25] : memref<1x256xf32, #tpu.memory_space<vmem>>, vector<1x256xf32>
    tpu.vector_store %arg8[%c0_24, %c0_25], %53 {strides = array<i32>} : memref<1x256xf32, #tpu.memory_space<vmem>>, vector<1x256xf32>,
    %c0_i32_26 = arith.constant 0 : i32
    %55 = arith.cmpi eq, %arg1, %c0_i32_26 : i32
    %56 = arith.extui %55 : i1 to i32
    %c0_i32_27 = arith.constant 0 : i32
    %57 = arith.cmpi ne, %56, %c0_i32_27 : i32
    scf.if %57 {
      %c0_28 = arith.constant 0 : index
      %c0_29 = arith.constant 0 : index
      %58 = vector.load %arg6[%c0_28, %c0_29] : memref<1x256xf32, #tpu.memory_space<vmem>>, vector<1x256xf32>
      %59 = vector.shape_cast %58 : vector<1x256xf32> to vector<1x1x256xf32>
      %cst_30 = arith.constant dense<0.000000e+00> : vector<1xf32>
      %60 = vector.multi_reduction <add>, %59, %cst_30 [1, 2] : vector<1x1x256xf32> to vector<1xf32>
      %61 = vector.shape_cast %60 : vector<1xf32> to vector<1x1x1xf32>
      %62 = vector.extract %61[0, 0, 0] : f32 from vector<1x1x1xf32>
      %c0_31 = arith.constant 0 : index
      %c0_32 = arith.constant 0 : index
      %63 = vector.load %arg7[%c0_31, %c0_32] : memref<1x256xf32, #tpu.memory_space<vmem>>, vector<1x256xf32>
      %64 = vector.shape_cast %63 : vector<1x256xf32> to vector<1x1x256xf32>
      %cst_33 = arith.constant dense<0.000000e+00> : vector<1xf32>
      %65 = vector.multi_reduction <add>, %64, %cst_33 [1, 2] : vector<1x1x256xf32> to vector<1xf32>
      %66 = vector.shape_cast %65 : vector<1xf32> to vector<1x1x1xf32>
      %67 = vector.extract %66[0, 0, 0] : f32 from vector<1x1x1xf32>
      %c0_34 = arith.constant 0 : index
      %c0_35 = arith.constant 0 : index
      %68 = vector.load %arg8[%c0_34, %c0_35] : memref<1x256xf32, #tpu.memory_space<vmem>>, vector<1x256xf32>
      %69 = vector.shape_cast %68 : vector<1x256xf32> to vector<1x1x256xf32>
      %cst_36 = arith.constant dense<0.000000e+00> : vector<1xf32>
      %70 = vector.multi_reduction <add>, %69, %cst_36 [1, 2] : vector<1x1x256xf32> to vector<1xf32>
      %71 = vector.shape_cast %70 : vector<1xf32> to vector<1x1x1xf32>
      %72 = vector.extract %71[0, 0, 0] : f32 from vector<1x1x1xf32>
      %73 = tpu.iota {dimensions = array<i32: 1>} : vector<1x128xi32>
      %c0_i32_37 = arith.constant 0 : i32
      %74 = vector.broadcast %c0_i32_37 : i32 to vector<1x128xi32>
      %75 = arith.cmpi eq, %73, %74 : vector<1x128xi32>
      %c1_i32 = arith.constant 1 : i32
      %76 = vector.broadcast %c1_i32 : i32 to vector<1x128xi32>
      %77 = arith.cmpi eq, %73, %76 : vector<1x128xi32>
      %c2_i32 = arith.constant 2 : i32
      %78 = vector.broadcast %c2_i32 : i32 to vector<1x128xi32>
      %79 = arith.cmpi eq, %73, %78 : vector<1x128xi32>
      %cst_38 = arith.constant 0.000000e+00 : f32
      %80 = vector.broadcast %72 : f32 to vector<1x128xf32>
      %81 = vector.broadcast %cst_38 : f32 to vector<1x128xf32>
      %82 = arith.select %79, %80, %81 : vector<1x128xi1>, vector<1x128xf32>
      %83 = vector.broadcast %67 : f32 to vector<1x128xf32>
      %84 = arith.select %77, %83, %82 : vector<1x128xi1>, vector<1x128xf32>
      %85 = vector.broadcast %62 : f32 to vector<1x128xf32>
      %86 = arith.select %75, %85, %84 : vector<1x128xi1>, vector<1x128xf32>
      %c0_39 = arith.constant 0 : index
      %c0_40 = arith.constant 0 : index
      %c0_41 = arith.constant 0 : index
      %87 = vector.load %arg5[%c0_39, %c0_40, %c0_41] : memref<1x1x128xf32, #tpu.memory_space<vmem>>, vector<1x1x128xf32>
      %88 = vector.shape_cast %87 : vector<1x1x128xf32> to vector<1x128xf32>
      %89 = vector.shape_cast %86 : vector<1x128xf32> to vector<1x1x128xf32>
      tpu.vector_store %arg5[%c0_39, %c0_40, %c0_41], %89 {strides = array<i32>} : memref<1x1x128xf32, #tpu.memory_space<vmem>>, vector<1x1x128xf32>,
    } else {
    }
    return
  }
  func.func @transform_0(%arg0: i32, %arg1: i32, %arg2: memref<1xi32, #tpu.memory_space<smem>>) -> (i32, i32, i32) {
    %c0_i32 = arith.constant 0 : i32
    %c0_i32_0 = arith.constant 0 : i32
    return %arg0, %c0_i32, %arg1 : i32, i32, i32
  }
  func.func @transform_1(%arg0: i32, %arg1: i32, %arg2: memref<1xi32, #tpu.memory_space<smem>>) -> (i32, i32, i32) {
    %c0_i32 = arith.constant 0 : i32
    %c0_i32_0 = arith.constant 0 : i32
    return %arg0, %c0_i32, %arg1 : i32, i32, i32
  }
  func.func @transform_2(%arg0: i32, %arg1: i32, %arg2: memref<1xi32, #tpu.memory_space<smem>>) -> (i32, i32, i32) {
    %c0_i32 = arith.constant 0 : i32
    %c0_i32_0 = arith.constant 0 : i32
    %c0_i32_1 = arith.constant 0 : i32
    return %arg0, %c0_i32, %c0_i32_0 : i32, i32, i32
  }
}

</mosaic_0001>

<bundles_post_ra>
// kernel: tpu_custom_call.1
= control target key start
LH: loop header
LB: loop body
LE: loop exit
PB: predicated region body
PF: predicated region fallthrough
CT: control target
= control target key end

     0   :  { %s1062_s0 = inlined_call_operand.<no memory space> [shape: s32[1], index: 0, kind: input, shape index: {}]   ;;  %s1063_s1 = inlined_call_operand.hbm [shape: f32[2,4,256], index: 1, kind: input, shape index: {}]   ;;  %s1064_s2 = inlined_call_operand.vmem [shape: s32[2,1,256], index: 2, kind: input, shape index: {}]   ;;  %s1065_s3 = inlined_call_operand.hbm [shape: f32[2,1,128], index: 3, kind: output, shape index: {}]  }
   0x1   :  { %8 = sst [smem:[#allocation6]] %s1062_s0 }
   0x2   :  { %9 = vsyncpa [#allocation8], 0 }
   0x3   :  { %11 = vsyncpa [#allocation8 + $0x1], 0 }
   0x4   :  { %12 = vsyncpa [#allocation9], 0 }
   0x5   :  { %14 = vsyncpa [#allocation9 + $0x1], 0  ;;  %s825_s14 = smov 0   ;;  %s827_s15 = smov 0  }
   0x6   :  { %s829_s16 = smov 0   ;;  %s831_s17 = smov 0  }
   0x7   :  { %s833_s18 = smov 0   ;;  %s835_s19 = smov 0  }
   0x8 LB: > { %s586_s0 = sadd.s32 4294967295, %s795_s19   ;;  %s587_s20 = sadd.s32 4294967294, %s795_s19   ;;  %s795_s19 = sphi %s835_s19, %s20_s19   ;;  %s791_s18 = sphi %s833_s18, %s1085_s18   ;;  %s787_s17 = sphi %s831_s17, %s1084_s17   ;;  %s783_s16 = sphi %s829_s16, %s1083_s16   ;;  %s779_s15 = sphi %s827_s15, %s1082_s15   ;;  %s775_s14 = sphi %s825_s14, %s1081_s14  }
   0x9   : > { %s32_s21 = sadd.s32 1, %s791_s18  ;;  %s41_s22 = sadd.s32 1, %s783_s16 }
   0xa   : > { %p34_p0 = scmp.ge.s32.totalorder %s32_s21, 2  ;;  %p48_p1 = scmp.ne.s32.totalorder %s783_s16, %s779_s15 }
   0xb   : > { %p49_p2 = scmp.eq.s32.totalorder %s795_s19, 0  ;;  %p54_p3 = scmp.ne.s32.totalorder %s779_s15, %s775_s14 }
   0xc   : > { %s1087_s21 = smov (%p34_p0, %s32_s21), 0  ;;  %p55_p5 = scmp.eq.s32.totalorder %s586_s0, 0 }
   0xd   : > { %p866_p4 = por %p49_p2, %p48_p1  ;;  %s36_s24 = ssub.s32 %s791_s18, %s1087_s21 }
   0xe   : > { %p106_p6 = scmp.eq.s32.totalorder %s586_s0, 1  ;;  %p39_p7 = scmp.eq.s32.totalorder %s36_s24, 0 }
   0xf   : > { %p872_p8 = por %p55_p5, %p54_p3  ;;  %p112_p10 = scmp.eq.s32.totalorder %s587_s20, 1 }
  0x10   : > { %p876_p9 = por %p106_p6, %p48_p1  ;;  %p619_p13 = scmp.lt.s32.totalorder %s795_s19, 2 }
  0x11   : > { %s881_s27 = scalar_select %p39_p7, %s783_s16, %s41_s22  }
  0x12   : > { %s1069_s26 = scalar_select %p876_p9, 1, 0 }
  0x13   : > { %p883_p11 = por %p112_p10, %p54_p3  ;;  %s132_s29 = sand.u32 1, %s783_s16  }
  0x14   : > { %s590_s30 = sshll.u32 %s132_s29, 3  ;;  %s600_s4 = sshll.u32 %s791_s18, 7 }
  0x15   : > { %s1070_s28 = scalar_select %p883_p11, 1, 0 }
  0x16   : > { %s894_s7 = scalar_lea.hbm %s1063_s1, %s600_s4  ;;  %s136_s8 = scalar_lea.vmem [#allocation7], %s590_s30 }
  0x17   : > { %s146_s9 = sshll.u32 %s136_s8, 4  ;;  %p900_p0 = pnand %p619_p13, %p866_p4  ;;  %s896_s9 = int_to_ptr.vmem [resolvable:$true] %s146_s9 }
  0x18   : > { %s133_s11 = scalar_lea.sflag [#allocation8], %s132_s29  ;;  %s683_s12 = scalar_lea.hbm %s894_s7, 128 }
  0x19   : > { %p684_p3 = scmp.ne.s32.totalorder %s894_s7, %s683_s12  ;;  %p685_p5 = pneg %p900_p0 }
  0x1a   : > { %s688_s20 = scalar_lea.hbm %s1063_s1, 256  ;;  %p689_p4 = scmp.lt.u32.totalorder %s894_s7, %s1063_s1 }
  0x1b   : > { %p686_p6 = pnand %p685_p5, %p684_p3  ;;  %p690_p10 = scmp.lt.u32.totalorder %s688_s20, %s683_s12 }
  0x1c   : > { %p692_p12 = scmp.lt.u32.totalorder %s683_s12, %s894_s7 }
  0x1d   : > { %p687_p7 = pneg %p686_p6  ;;  %p691_p13 = por %p690_p10, %p689_p4 }
  0x1f   : > { %p693_p1 = por %p692_p12, %p691_p13 }
  0x21   : > { %p694_p2 = pnand %p693_p1, %p687_p7 }
  0x23   : > { %697 = shalt.err (!%p694_p2)
}
  0x24   : > { %s698_s24 = scalar_lea.vmem %s896_s9, 128  ;;  %s797_s29 = smov [#allocation7]  }
  0x25   : > { %p699_p3 = scmp.ne.s32.totalorder %s896_s9, %s698_s24  ;;  %s703_s30 = sshll.u32 %s797_s29, 4  ;;  %s704_s30 = int_to_ptr.vmem [resolvable:$false] %s703_s30 }
  0x26   : > { %s705_s4 = scalar_lea.vmem %s704_s30, 256  ;;  %p706_p9 = scmp.lt.s32.totalorder %s896_s9, %s704_s30 }
  0x27   : > { %p701_p6 = pnand %p699_p3, %p685_p5  ;;  %p707_p4 = scmp.lt.s32.totalorder %s705_s4, %s698_s24 }
  0x29   : > { %p702_p11 = pneg %p701_p6  ;;  %p708_p10 = por %p707_p4, %p706_p9 }
  0x2b   : > { %p709_p12 = pnand %p708_p10, %p702_p11 }
  0x2d   : > { %712 = shalt.err (!%p709_p12)
}
  0x2e   : > { %614 = dma.hbm_to_vmem [thread:$0]  (!%p900_p0), %s894_s7, 128, %s896_s9, %s133_s11  }
  0x2f   : > { %p1072_p1 = scmp.lt.s32.totalorder %s795_s19, 3  ;;  %p1073_p2 = scmp.ge.s32.totalorder %s795_s19, 1 }
  0x31   : > { %p164_p5 = pnand %p1073_p2, %p1072_p1 }
  0x32   : > { %s936_s5 = sand.u32 (!%p164_p5), 1, %s779_s15  }
  0x33   : > { %167 = sbr.rel (%p164_p5) target bundleno = 381 (0x17d), region = 28  ;;  %s594_s6 = sshll.u32 (!%p164_p5), %s936_s5, 3 }
  0x34   : > { %s170_s8 = scalar_lea.sflag (!%p164_p5), [#allocation8], %s936_s5  ;;  %s173_s12 = scalar_lea.vmem (!%p164_p5), [#allocation7], %s594_s6 }
  0x3a   : > { %766 = dma.done.wait (%p872_p8), %s170_s8, 128  }
  0x3b   : > { %768 = vsyncadd (%p872_p8), %s170_s8, 4294967168  ;;  %p203_p9 = scmp.lt.s32.totalorder %s787_s17, 1  ;;  %v215_v0 = vlaneseq  ;;  %v798_v2 = vmov 1966171168   ;;  %v799_v4 = vmov 0.0   ;;  %vm236_vm1 = vcmask 1043456  }
  0x3c   : > { %v318_v3 = vunpack.c.l.s4 %v798_v2  ;;  %v800_v7 = vmov 1   ;;  %v222_v10 = vld [vmem:[%s173_s12] sm:$0xff]  ;;  %s282_s13 = sld [smem:[#allocation6]]  ;;  %vm410_vm8 = vcmask 1040384   ;;  %s597_s22 = sshll.u32 %s787_s17, 4 }
  0x3d   : > { %s204_s7 = scalar_select %p203_p9, %s787_s17, 1  ;;  %vm947_vm0 = vcmp.lt.s32.totalorder %v215_v0, 256  ;;  %v286_v5 = vshrl.u32 %v215_v0, 7  ;;  %v316_v8 = vcombine.low %v800_v7, %v800_v7  ;;  %v234_v11 = vcombine.high %v222_v10, %v222_v10 }
  0x3e   : > { %219 = vst.msk [vmem:[#allocation2] sm:$0x3] %vm947_vm0, %v799_v4  ;;  %220 = vst.msk [vmem:[#allocation3] sm:$0x3] %vm947_vm0, %v799_v4  ;;  %v319_v6 = vunpack.c.0.s8 %v318_v3  ;;  %v237_v12 = vsel %vm236_vm1, %v222_v10, -inf  ;;  %s200_s24 = scalar_lea.vmem [#allocation10], %s936_s5  ;;  %s1013_s6 = scalar_lea.hbm %s1065_s3, %s597_s22 }
  0x3f   : > { %221 = vst.msk [vmem:[#allocation4] sm:$0x3] %vm947_vm0, %v799_v4  ;;  %s595_s25 = sshll.u32 %s204_s7, 1  ;;  %v238_v13 = vrot.slane %v237_v12, 4  ;;  %v244_v15 = vsel %vm236_vm1, %v234_v11, -inf  ;;  %v975_v37 = vsub.s32 0, %v286_v5 }
  0x40   : > { %v958_v9 = vsub.s32 %v319_v6, %v286_v5  ;;  %s209_s11 = scalar_lea.vmem %s1064_s2, %s595_s25  ;;  %v245_v18 = vrot.slane %v244_v15, 4  ;;  %v977_v39 = vsub.s32 1, %v286_v5  ;;  %s494_s29 = sshll.u32 %s200_s24, 4  ;;  %s1015_s29 = int_to_ptr.vmem [resolvable:$true] %s494_s29 }
  0x41   : > { %v223_v16 = vld [vmem:[%s209_s11] sm:$0x3]  ;;  %v239_v17 = vmax.f32 %v237_v12, %v238_v13  ;;  %s482_s17 = scalar_lea.sflag [#allocation9], %s936_s5  ;;  %s713_s8 = scalar_lea.vmem %s1015_s29, 16 }
  0x42   : > { %v323_v14 = vrot.slane %v316_v8, %v958_v9  ;;  %vm313_vm2 = vcmp.ne.s32.totalorder %v223_v16, 255  ;;  %v246_v21 = vmax.f32 %v244_v15, %v245_v18  ;;  %vm281_vm5 = vcmp.eq.s32.totalorder %v223_v16, 255  ;;  %p714_p8 = scmp.ne.s32.totalorder %s1015_s29, %s713_s8  ;;  %p1078_p11 = scmp.ne.s32.totalorder %s1069_s26, 0 }
  0x43   : > { %v240_v20 = vrot.slane %v239_v17, 2  ;;  %v283_v35 = vstv %s282_s13  ;;  %s801_s12 = smov [#allocation10]  }
  0x44   : > { %v330_v19 = vrot.slane %v323_v14, %v958_v9  ;;  %v247_v23 = vrot.slane %v246_v21, 2  ;;  %v284_v38 = vsel %vm281_vm5, %v283_v35, %v223_v16  ;;  %p715_p0 = pnand %p714_p8, %p1078_p11  ;;  %s717_s7 = sshll.u32 %s801_s12, 4  ;;  %s718_s7 = int_to_ptr.vmem [resolvable:$false] %s717_s7 }
  0x45   : > { %v241_v22 = vmax.f32 %v239_v17, %v240_v20  ;;  %v361_v25 = vld [vmem:[#allocation3] sm:$0x3]  ;;  %v290_v40 = vrot.slane %v284_v38, %v975_v37  ;;  %v294_v41 = vrot.slane %v284_v38, %v977_v39  ;;  %s719_s25 = scalar_lea.vmem %s718_s7, 32  ;;  %p720_p13 = scmp.lt.s32.totalorder %s1015_s29, %s718_s7 }
  0x46   : > { %vm331_vm3 = vcmp.ne.s32.totalorder %v330_v19, 0  ;;  %v248_v28 = vmax.f32 %v246_v21, %v247_v23  ;;  %p716_p7 = pneg %p715_p0  ;;  %p721_p3 = scmp.lt.s32.totalorder %s719_s25, %s713_s8 }
  0x47   : > { %vm967_vm4 = vmand %vm313_vm2, %vm331_vm3  ;;  %v242_v27 = vrot.slane %v241_v22, 1  ;;  %vm295_vm6 = vcmp.eq.s32.totalorder %v286_v5, %v290_v40  ;;  %vm296_vm7 = vcmp.eq.s32.totalorder %v286_v5, %v294_v41 }
  0x48   : > { %v596_v26 = vsel %vm967_vm4, 1.0, %v799_v4  ;;  %v249_v31 = vrot.slane %v248_v28, 1  ;;  %v297_v42 = vsel %vm295_vm6, %v222_v10, 0.0  ;;  %v298_v46 = vsel %vm296_vm7, %v234_v11, 0.0  ;;  %p722_p6 = por %p721_p3, %p720_p13 }
  0x49   : > { %v364_v29 = vadd.f32 %v596_v26, %v361_v25  ;;  %v243_v30 = vmax.f32 %v241_v22, %v242_v27  ;;  %v299_v48 = vsel %vm236_vm1, %v297_v42, 0.0  ;;  %v306_v52 = vsel %vm236_vm1, %v298_v46, 0.0  ;;  %v372_v42 = vld [vmem:[#allocation4] sm:$0x3] }
  0x4a   : > { %v250_v32 = vmax.f32 %v248_v28, %v249_v31  ;;  %v300_v53 = vrot.slane %v299_v48, 4  ;;  %v307_v56 = vrot.slane %v306_v52, 4  ;;  %v333_v28 = vld [vmem:[#allocation2] sm:$0x3]  ;;  %p723_p4 = pnand %p722_p6, %p716_p7 }
  0x4b   : > { %365 = vst.msk [vmem:[#allocation3] sm:$0x3] %vm947_vm0, %v364_v29 }
  0x4c   : > { %v253_v33 = vcombine.low %v243_v30, %v250_v32  ;;  %v301_v59 = vadd.f32 %v300_v53, %v299_v48  ;;  %v308_v62 = vadd.f32 %v307_v56, %v306_v52 }
  0x4e   : > { %v255_v34 = vsub.f32 %v222_v10, %v253_v33  ;;  %v302_v3 = vrot.slane %v301_v59, 2  ;;  %v309_v5 = vrot.slane %v308_v62, 2 }
  0x50   : > { %v256_v36 = vmul.f32 1.442695, %v255_v34  ;;  %v303_v6 = vadd.f32 %v302_v3, %v301_v59  ;;  %v310_v7 = vadd.f32 %v309_v5, %v308_v62 }
  0x52   : > { %673 = vpow2.f32 %v256_v36  ;;  %v304_v8 = vrot.slane %v303_v6, 1  ;;  %v311_v10 = vrot.slane %v310_v7, 1  ;;  %v423_v33 = vld [vmem:[#allocation3] sm:$0x3] }
  0x53   : > { %v428_v36 = vrot.slane %v423_v33, %v975_v37  ;;  %v432_v40 = vrot.slane %v423_v33, %v977_v39 }
  0x54   : > { %v305_v13 = vadd.f32 %v304_v8, %v303_v6  ;;  %v312_v17 = vadd.f32 %v311_v10, %v310_v7 }
  0x55   : > { %v436_v48 = vsel %vm410_vm8, %v432_v40, 0.0 }
  0x5c   : > { %v674_v43 = vpop.eup %673 }
  0x5d   : > { %v259_v44 = vcombine.high %v674_v43, %v674_v43  ;;  %v261_v45 = vsel %vm236_vm1, %v674_v43, 0.0 }
  0x5e   : > { %v262_v47 = vrot.slane %v261_v45, 4 }
  0x5f   : > { %v268_v49 = vsel %vm236_vm1, %v259_v44, 0.0 }
  0x60   : > { %v263_v50 = vadd.f32 %v262_v47, %v261_v45  ;;  %v269_v51 = vrot.slane %v268_v49, 4  ;;  %v435_v45 = vsel %vm410_vm8, %v428_v36, 0.0 }
  0x62   : > { %v264_v54 = vrot.slane %v263_v50, 2  ;;  %v270_v55 = vadd.f32 %v269_v51, %v268_v49  ;;  %v437_v51 = vadd.f32 %v436_v48, %v435_v45 }
  0x64   : > { %v265_v57 = vadd.f32 %v264_v54, %v263_v50  ;;  %v271_v58 = vrot.slane %v270_v55, 2 }
  0x66   : > { %v266_v60 = vrot.slane %v265_v57, 1  ;;  %v272_v61 = vadd.f32 %v271_v58, %v270_v55 }
  0x68   : > { %v267_v63 = vadd.f32 %v266_v60, %v265_v57  ;;  %v273_v2 = vrot.slane %v272_v61, 1 }
  0x6a   : > { %v274_v4 = vadd.f32 %v273_v2, %v272_v61  ;;  %675 = vlog2.f32 %v267_v63 }
  0x6c   : > { %677 = vlog2.f32 %v274_v4 }
  0x74   : > { %v676_v11 = vpop.eup %675 }
  0x75   : > { %v276_v12 = vmul.f32 0.6931472, %v676_v11 }
  0x76   : > { %v678_v14 = vpop.eup %677 }
  0x77   : > { %v278_v15 = vmul.f32 0.6931472, %v678_v14  ;;  %v279_v16 = vadd.f32 %v276_v12, %v243_v30  ;;  %v225_v14 = vand.u32 127, %v215_v0 }
  0x79   : > { %v280_v18 = vadd.f32 %v278_v15, %v250_v32  ;;  %v334_v19 = vsub.f32 %v279_v16, %v305_v13  ;;  %v366_v20 = vsub.f32 %v305_v13, %v279_v16  ;;  %vm473_vm9 = vcmp.eq.s32.totalorder %v225_v14, 2 }
  0x7a   : > { %vm472_vm10 = vcmp.eq.s32.totalorder %v225_v14, 1  ;;  %vm471_vm11 = vcmp.eq.s32.totalorder %v225_v14, 0 }
  0x7b   : > { %v335_v21 = vsub.f32 %v280_v18, %v312_v17  ;;  %v367_v22 = vsub.f32 %v312_v17, %v280_v18  ;;  %v368_v23 = vmul.f32 1.442695, %v366_v20 }
  0x7d   : > { %v338_v25 = vcombine.low %v334_v19, %v335_v21  ;;  %679 = vpow2.f32 %v368_v23  ;;  %v370_v26 = vmul.f32 1.442695, %v367_v22 }
  0x7f   : > { %v345_v27 = vrot.slane %v338_v25, %v958_v9  ;;  %681 = vpow2.f32 %v370_v26 }
  0x81   : > { %v352_v29 = vrot.slane %v345_v27, %v958_v9 }
  0x83   : > { %v354_v31 = vsel %vm967_vm4, %v352_v29, 0.0 }
  0x84   : > { %v355_v30 = vadd.f32 %v354_v31, %v333_v28 }
  0x86   : > { %360 = vst.msk [vmem:[#allocation2] sm:$0x3] %vm947_vm0, %v355_v30 }
  0x87   : > { %v680_v32 = vpop.eup %679 }
  0x89   : > { %v682_v34 = vpop.eup %681 }
  0x8a   : > { %v377_v35 = vcombine.low %v680_v32, %v682_v34 }
  0x8c   : > { %v384_v38 = vrot.slane %v377_v35, %v958_v9 }
  0x8d   : > { %v398_v41 = vld [vmem:[#allocation2] sm:$0x3] }
  0x8e   : > { %v403_v24 = vrot.slane %v398_v41, %v975_v37  ;;  %v407_v43 = vrot.slane %v398_v41, %v977_v39  ;;  %v391_v44 = vrot.slane %v384_v38, %v958_v9 }
  0x90   : > { %v411_v46 = vsel %vm410_vm8, %v403_v24, 0.0  ;;  %v412_v47 = vsel %vm410_vm8, %v407_v43, 0.0  ;;  %v393_v49 = vadd.f32 %v391_v44, %v372_v42 }
  0x91   : > { %v413_v50 = vadd.f32 %v412_v47, %v411_v46 }
  0x92   : > { %394 = vst.msk [vmem:[#allocation4] sm:$0x3] %vm947_vm0, %v393_v49 }
  0x93   : > { %414 = vadd.xlane.f32.xlu0 %v413_v50 }
  0x97   : > { %438 = vadd.xlane.f32.xlu0 %v437_v51 }
  0x99   : > { %v447_v52 = vld [vmem:[#allocation4] sm:$0x3] }
  0x9a   : > { %v452_v53 = vrot.slane %v447_v52, %v975_v37  ;;  %v456_v9 = vrot.slane %v447_v52, %v977_v39 }
  0x9c   : > { %v459_v54 = vsel %vm410_vm8, %v452_v53, 0.0  ;;  %v460_v55 = vsel %vm410_vm8, %v456_v9, 0.0 }
  0x9d   : > { %v461_v56 = vadd.f32 %v460_v55, %v459_v54 }
  0x9f   : > { %462 = vadd.xlane.f32.xlu1 %v461_v56 }
 0x120   : > { %v415_v57 = vpop.xlane.xlu0 %414 }
 0x121   : > { %v416_v58 = vrot.slane %v415_v57, 4 }
 0x123   : > { %v417_v59 = vadd.f32 %v416_v58, %v415_v57 }
 0x124   : > { %v439_v60 = vpop.xlane.xlu0 %438 }
 0x125   : > { %v418_v1 = vrot.slane %v417_v59, 2  ;;  %v440_v61 = vrot.slane %v439_v60, 4 }
 0x127   : > { %v441_v62 = vadd.f32 %v440_v61, %v439_v60  ;;  %v419_v63 = vadd.f32 %v418_v1, %v417_v59 }
 0x129   : > { %v442_v2 = vrot.slane %v441_v62, 2  ;;  %v420_v3 = vrot.slane %v419_v63, 1 }
 0x12b   : > { %v443_v4 = vadd.f32 %v442_v2, %v441_v62  ;;  %v421_v37 = vadd.f32 %v420_v3, %v419_v63 }
 0x12c   : > { %v463_v5 = vpop.xlane.xlu1 %462 }
 0x12d   : > { %v464_v39 = vrot.slane %v463_v5, 4  ;;  %601 = vpush %v421_v37  ;;  %v444_v6 = vrot.slane %v443_v4, 1 }
 0x12f   : > { %v465_v7 = vadd.f32 %v464_v39, %v463_v5  ;;  %v445_v8 = vadd.f32 %v444_v6, %v443_v4 }
 0x131   : > { %v466_v10 = vrot.slane %v465_v7, 2  ;;  %603 = vpush %v445_v8 }
 0x133   : > { %v467_v11 = vadd.f32 %v466_v10, %v465_v7 }
 0x135   : > { %v468_v12 = vrot.slane %v467_v11, 1 }
 0x137   : > { %v469_v13 = vadd.f32 %v468_v12, %v467_v11 }
 0x139   : > { %605 = vpush %v469_v13 }
 0x15e   : > { %s602_s0 = spop %601 }
 0x15f   : > { %v478_v18 = vstv %s602_s0 }
 0x162   : > { %s604_s20 = spop %603 }
 0x163   : > { %v476_v16 = vstv %s604_s20 }
 0x16a   : > { %s606_s23 = spop %605 }
 0x16b   : > { %v474_v15 = vstv %s606_s23 }
 0x16c   : > { %v475_v17 = vsel %vm473_vm9, %v474_v15, 0.0 }
 0x16d   : > { %v477_v19 = vsel %vm472_vm10, %v476_v16, %v475_v17 }
 0x16e   : > { %v479_v0 = vsel %vm471_vm11, %v478_v18, %v477_v19 }
 0x16f   : > { %480 = vst [vmem:[%s200_s24] sm:$0x1] %v479_v0 }
 0x170   : > { %726 = shalt.err (!%p723_p4)
}
 0x171   : > { %s727_s5 = scalar_lea.hbm %s1013_s6, 16  ;;  %s731_s11 = scalar_lea.hbm %s1065_s3, 32 }
 0x172   : > { %p728_p10 = scmp.ne.s32.totalorder %s1013_s6, %s727_s5  ;;  %p732_p2 = scmp.lt.u32.totalorder %s1013_s6, %s1065_s3 }
 0x173   : > { %p733_p5 = scmp.lt.u32.totalorder %s731_s11, %s727_s5  ;;  %p735_p8 = scmp.lt.u32.totalorder %s727_s5, %s1013_s6 }
 0x174   : > { %p729_p12 = pnand %p728_p10, %p1078_p11 }
 0x175   : > { %p734_p9 = por %p733_p5, %p732_p2 }
 0x176   : > { %p730_p1 = pneg %p729_p12 }
 0x177   : > { %p736_p0 = por %p735_p8, %p734_p9 }
 0x179   : > { %p737_p7 = pnand %p736_p0, %p730_p1 }
 0x17b   : > { %740 = shalt.err (!%p737_p7)
}
 0x17c   : > { %609 = dma.vmem_to_hbm [thread:$0]  (%p1078_p11), %s1015_s29, 16, %s1013_s6, %s482_s17  }
 0x17d PF: > { %s506_s20 = sand.u32 1, %s775_s14   ;;  %p1079_p13 = scmp.ne.s32.totalorder %s1070_s28, 0 }
 0x17e   : > { %p1080_p3 = scmp.ge.s32.totalorder %s795_s19, 2  ;;  %s507_s22 = scalar_lea.sflag [#allocation9], %s506_s20 }
 0x180   : > { %p616_p6 = pnand %p1080_p3, %p1079_p13 }
 0x182   : > { %770 = dma.done.wait (!%p616_p6), %s507_s22, 16  }
 0x183   : > { %772 = vsyncadd (!%p616_p6), %s507_s22, 4294967280  ;;  %s20_s19 = sadd.s32 1, %s795_s19   ;;  %s1081_s14 = smov %s779_s15 }
 0x184   : > { %p17_p4 = scmp.ge.s32.totalorder %s20_s19, 4   ;;  %s1082_s15 = smov %s783_s16 }
 0x185   : > { %s1083_s16 = smov %s881_s27  ;;  %s1084_s17 = smov %s791_s18 }
 0x186   : > { %s1085_s18 = smov %s1087_s21  ;;  %19 = sbr.rel (!%p17_p4) target bundleno = 8 (0x8), region = 84 }
 0x18d   :  { %511 = vsyncpa [#allocation8], 1 }
 0x18e   :  { %513 = vsyncpa [#allocation8 + $0x1], 1 }
 0x18f   :  { %514 = vsyncpa [#allocation9], 1 }
 0x190   :  { %516 = vsyncpa [#allocation9 + $0x1], 1 }

</bundles_post_ra>
